<compile_context>
chip_gen: v6e
topology: v6e:2x2x1
jax: 0.10.0
libtpu: 0.0.40
codegen_flags: <defaults>
</compile_context>

<pallas_src>
import functools

import jax
import jax.numpy as jnp
from jax import lax
from jax.experimental import pallas as pl
from jax.experimental.pallas import tpu as pltpu


def _round_up(v, m):
    return (v + m - 1) // m * m


def _sublane_pack(dtype):
    # vregs pack sub-32-bit dtypes along the sublane axis: 8 rows for 32-bit,
    # 16 for 16-bit, 32 for 8-bit.  Row tiles must be a multiple of this.
    return {4: 8, 2: 16, 1: 32}.get(jnp.dtype(dtype).itemsize, 8)


def _choose_row_tile(R, pack, L_lane):
    """Pick (rt, R_pad): row-tile (multiple of `pack`) and padded row count."""
    R_pad_min = _round_up(R, pack)
    # ~4 MiB per x block, sized against the in-kernel f32 working set
    # (4 bytes/elem, not the input itemsize).  Big blocks amortize the
    # ~0.35 us per-grid-step overhead (biggest win on v7x's 3.2 TB/s HBM).
    rt = max(pack, ((4 << 20) // (L_lane * 4)) // pack * pack)
    rt = min(rt, R_pad_min)
    # v7x megacore: the row axis is "parallel" and gets sharded across the two
    # TensorCores -> prefer >= 4 grid steps (and an even count) when the row
    # count allows it without breaking sublane packing.  v5e/v6e (1 TC) are
    # insensitive; for large workloads the 4 MiB cap above binds first anyway.
    n_units = R_pad_min // pack
    if n_units >= 4:
        rt = min(rt, (n_units // 4) * pack)          # at least 4 steps
        steps = -(-R_pad_min // rt)                  # cdiv
        if steps % 2:                                # try to make it even
            alt = (-(-R_pad_min // (steps + 1))) // pack * pack
            if alt >= pack:
                rt = min(rt, alt)
    R_pad = _round_up(R_pad_min, rt)
    return rt, R_pad


def _dwconv1d_kernel(x_ref, w_ref, b_ref, o_ref, *, K, pad_left, L_valid, L_out):
    # x_ref: (rt, L_lane)  rows = folded (batch, channel); lanes >= L_valid are zero
    # w_ref: (rt, K)       per-row taps (row r -> channel r % C)
    # b_ref: (rt, 1)       per-row bias
    # o_ref: (rt, L_lane)  lanes >= L_out are garbage, sliced off in the wrapper
    L_lane = x_ref.shape[1]
    x = x_ref[...].astype(jnp.float32)          # single load of the tile
    w = w_ref[...].astype(jnp.float32)          # hoisted weight load

    # Static mask analysis.  For output lanes t < L_out, tap k reads
    # x[(t + k - pad_left) mod L_lane] after the rotate.  Reads landing in
    # [L_valid, L_lane) hit the wrapper's zero padding (correct F.pad zeros),
    # so a runtime mask is only needed when a read can WRAP past either end of
    # the lane axis into non-zero data.
    def _needs_low(k):   # t + off < 0 wraps to lanes [L_lane + off, L_lane)
        off = k - pad_left
        return off < 0 and (L_lane + off) < L_valid

    def _needs_high(k):  # t + off can reach L_lane and wrap back to lane 0
        off = k - pad_left
        return (L_out - 1) + off >= L_lane

    any_mask = any(_needs_low(k) or _needs_high(k) for k in range(K))
    lane = lax.broadcasted_iota(jnp.int32, o_ref.shape, 1) if any_mask else None

    acc = None
    for k in range(K):                           # small static K -> unrolled
        off = k - pad_left
        shift = (-off) % L_lane
        # XLU rotate (separate issue slot from the VPU MAC):
        # xk[:, t] == x[:, (t + off) mod L_lane]
        xk = pltpu.roll(x, shift=shift, axis=1) if shift else x
        need_lo, need_hi = _needs_low(k), _needs_high(k)
        if need_lo or need_hi:
            # Single compare against a static constant per bound (no lane+off
            # add); emitted only for taps that can actually wrap.
            if need_lo and need_hi:
                valid = (lane >= -off) & (lane < L_valid - off)
            elif need_lo:
                valid = lane >= -off
            else:
                valid = lane < L_valid - off
            xk = jnp.where(valid, xk, 0.0)
        term = xk * w[:, k:k + 1]                # (rt, 1) per-row scalar operand
        acc = term if acc is None else acc + term

    # Bias added once from the (rt, 1) operand (no full-tile broadcast temp).
    o_ref[...] = (acc + b_ref[...].astype(jnp.float32)).astype(o_ref.dtype)


@functools.partial(jax.jit, static_argnames=("padding",))
def depthwise_conv1d(x, weight, bias, *, padding):
    """PyTorch-equivalent depthwise conv1d.

    x:      (N, C, L)
    weight: (C, 1, K)   (PyTorch depthwise Conv1d weight layout)
    bias:   (C,)
    padding: (pad_left, pad_right) applied to the last dim before the conv.
    returns (N, C, L_out), L_out = L + pad_left + pad_right - K + 1
    """
    N, C, L = x.shape
    C_out, _, K = weight.shape
    assert C_out == C, "kernel implemented for chan_out == chan_in (depthwise)"
    pad_left, pad_right = padding
    L_out = L + pad_left + pad_right - K + 1
    assert L_out > 0

    # ---- layout plumbing (no-ops for realistic shapes) ----------------------
    R = N * C                                    # fold batch onto the sublane axis
    L_lane = _round_up(max(L, L_out), 128)       # lane-dense tiles (unmasked stores)
    pack = _sublane_pack(x.dtype)
    rt, R_pad = _choose_row_tile(R, pack, L_lane)

    x2d = x.reshape(R, L)
    if L_lane != L or R_pad != R:
        # Only triggers when L is not already a multiple of 128 (or R % rt != 0).
        x2d = jnp.pad(x2d, ((0, R_pad - R), (0, L_lane - L)))

    # Per-row parameters (tiny: R*K and R elements); row r -> channel r % C.
    w2d = jnp.tile(weight.reshape(C, K), (N, 1))
    b2d = jnp.tile(bias.reshape(C, 1), (N, 1))
    if R_pad != R:
        w2d = jnp.pad(w2d, ((0, R_pad - R), (0, 0)))
        b2d = jnp.pad(b2d, ((0, R_pad - R), (0, 0)))

    kernel = functools.partial(
        _dwconv1d_kernel, K=K, pad_left=pad_left, L_valid=L, L_out=L_out)

    # TODO(synk): for very large L, additionally tile the lane axis with a K-1
    # halo (overlapping lane blocks via the index_map) instead of one full-L block.
    out = pl.pallas_call(
        kernel,
        out_shape=jax.ShapeDtypeStruct((R_pad, L_lane), x.dtype),
        grid=(R_pad // rt,),
        in_specs=[
            pl.BlockSpec((rt, L_lane), lambda i: (i, 0)),
            pl.BlockSpec((rt, K), lambda i: (i, 0)),
            pl.BlockSpec((rt, 1), lambda i: (i, 0)),
        ],
        out_specs=pl.BlockSpec((rt, L_lane), lambda i: (i, 0)),
        compiler_params=pltpu.CompilerParams(
            dimension_semantics=("parallel",),
            vmem_limit_bytes=48 * 1024 * 1024,
        ),
    )(x2d, w2d, b2d)

    return out[:R, :L_out].reshape(N, C, L_out)


def _reference(x, weight, bias, padding):
    # Pure-JAX reference matching PyTorch F.pad + Conv1d(groups=C).
    pad_left, pad_right = padding
    x_pad = jnp.pad(x, ((0, 0), (0, 0), (pad_left, pad_right)))
    C, _, K = weight.shape
    L_out = x_pad.shape[-1] - K + 1
    out = jnp.zeros((x.shape[0], C, L_out), dtype=jnp.float32)
    for k in range(K):
        out = out + x_pad[:, :, k:k + L_out] * weight[:, 0, k][None, :, None]
    return out + bias[None, :, None]


if __name__ == "__main__":
    # Small shapes consistent with the module: N=2, C=4, L=16, K=3.
    N, C, L, K = 2, 4, 16, 3

    key = jax.random.PRNGKey(0)
    kx, kw, kb = jax.random.split(key, 3)
    x = jax.random.normal(kx, (N, C, L), dtype=jnp.float32)
    # PyTorch shapes: weight (C_out, 1, K), bias (C_out,).
    weight = jax.random.normal(kw, (C, 1, K), dtype=jnp.float32) * 0.1
    bias = jax.random.normal(kb, (C,), dtype=jnp.float32) * 0.1

    # Case 1: causal padding (the typical use of this module).
    out = jax.block_until_ready(depthwise_conv1d(x, weight, bias, padding=(2, 0)))
    ref = _reference(x, weight, bias, (2, 0))
    assert out.shape == ref.shape, (out.shape, ref.shape)
    assert jnp.allclose(out, ref, atol=1e-5, rtol=1e-5), "mismatch (causal)"

    # Case 2: symmetric padding (negative and positive tap offsets).
    out2 = jax.block_until_ready(depthwise_conv1d(x, weight, bias, padding=(1, 1)))
    ref2 = _reference(x, weight, bias, (1, 1))
    assert out2.shape == ref2.shape, (out2.shape, ref2.shape)
    assert jnp.allclose(out2, ref2, atol=1e-5, rtol=1e-5), "mismatch (same)"

    # Case 3: L a multiple of 128 -> exercises the masked-tap paths where a
    # rotated read could wrap into non-zero lanes.
    L3 = 128
    x3 = jax.random.normal(jax.random.PRNGKey(1), (N, C, L3), dtype=jnp.float32)
    out3 = jax.block_until_ready(depthwise_conv1d(x3, weight, bias, padding=(1, 1)))
    ref3 = _reference(x3, weight, bias, (1, 1))
    assert out3.shape == ref3.shape, (out3.shape, ref3.shape)
    assert jnp.allclose(out3, ref3, atol=1e-5, rtol=1e-5), "mismatch (wrap-masked)"

    print("KERNEL_OK")
</pallas_src>

<mosaic_0001>
module attributes {stable_mosaic.version = 11 : i64} {
  func.func @_dwconv1d_kernel(%arg0: i32, %arg1: memref<8x128xf32, #tpu.memory_space<vmem>>, %arg2: memref<8x3xf32, #tpu.memory_space<vmem>>, %arg3: memref<8x1xf32, #tpu.memory_space<vmem>>, %arg4: memref<8x128xf32, #tpu.memory_space<vmem>>) attributes {dimension_semantics = [#tpu.dimension_semantics<parallel>], iteration_bounds = array<i64: 1>, scalar_prefetch = 0 : i64, scratch_operands = 0 : i64, tpu.core_type = #tpu.core_type<tc>, window_params = [{transform_indices = @transform_0, window_bounds = array<i64: 8, 128>}, {transform_indices = @transform_1, window_bounds = array<i64: 8, 3>}, {transform_indices = @transform_2, window_bounds = array<i64: 8, 1>}, {transform_indices = @transform_3, window_bounds = array<i64: 8, 128>}]} {
    %c0 = arith.constant 0 : index
    %c0_0 = arith.constant 0 : index
    %0 = vector.load %arg1[%c0, %c0_0] : memref<8x128xf32, #tpu.memory_space<vmem>>, vector<8x128xf32>
    %c0_1 = arith.constant 0 : index
    %c0_2 = arith.constant 0 : index
    %1 = vector.load %arg2[%c0_1, %c0_2] : memref<8x3xf32, #tpu.memory_space<vmem>>, vector<8x3xf32>
    %c2_i32 = arith.constant 2 : i32
    %2 = tpu.dynamic_rotate %0 by %c2_i32 dim 1 : vector<8x128xf32>, i32 -> vector<8x128xf32>
    %3 = vector.extract_strided_slice %1 {offsets = [0, 0], sizes = [8, 1], strides = [1, 1]} : vector<8x3xf32> to vector<8x1xf32>
    %4 = vector.broadcast %3 : vector<8x1xf32> to vector<8x128xf32>
    %5 = arith.mulf %2, %4 : vector<8x128xf32>
    %c1_i32 = arith.constant 1 : i32
    %6 = tpu.dynamic_rotate %0 by %c1_i32 dim 1 : vector<8x128xf32>, i32 -> vector<8x128xf32>
    %7 = vector.extract_strided_slice %1 {offsets = [0, 1], sizes = [8, 1], strides = [1, 1]} : vector<8x3xf32> to vector<8x1xf32>
    %8 = vector.broadcast %7 : vector<8x1xf32> to vector<8x128xf32>
    %9 = arith.mulf %6, %8 : vector<8x128xf32>
    %10 = arith.addf %5, %9 : vector<8x128xf32>
    %11 = vector.extract_strided_slice %1 {offsets = [0, 2], sizes = [8, 1], strides = [1, 1]} : vector<8x3xf32> to vector<8x1xf32>
    %12 = vector.broadcast %11 : vector<8x1xf32> to vector<8x128xf32>
    %13 = arith.mulf %0, %12 : vector<8x128xf32>
    %14 = arith.addf %10, %13 : vector<8x128xf32>
    %c0_3 = arith.constant 0 : index
    %c0_4 = arith.constant 0 : index
    %15 = vector.load %arg3[%c0_3, %c0_4] : memref<8x1xf32, #tpu.memory_space<vmem>>, vector<8x1xf32>
    %16 = vector.broadcast %15 : vector<8x1xf32> to vector<8x128xf32>
    %17 = arith.addf %14, %16 : vector<8x128xf32>
    %c0_5 = arith.constant 0 : index
    %c0_6 = arith.constant 0 : index
    %18 = vector.load %arg4[%c0_5, %c0_6] : memref<8x128xf32, #tpu.memory_space<vmem>>, vector<8x128xf32>
    tpu.vector_store %arg4[%c0_5, %c0_6], %17 {strides = array<i32>} : memref<8x128xf32, #tpu.memory_space<vmem>>, vector<8x128xf32>,
    return
  }
  func.func @transform_0(%arg0: i32) -> (i32, i32) {
    %c0_i32 = arith.constant 0 : i32
    %c0_i32_0 = arith.constant 0 : i32
    return %arg0, %c0_i32 : i32, i32
  }
  func.func @transform_1(%arg0: i32) -> (i32, i32) {
    %c0_i32 = arith.constant 0 : i32
    %c0_i32_0 = arith.constant 0 : i32
    return %arg0, %c0_i32 : i32, i32
  }
  func.func @transform_2(%arg0: i32) -> (i32, i32) {
    %c0_i32 = arith.constant 0 : i32
    %c0_i32_0 = arith.constant 0 : i32
    return %arg0, %c0_i32 : i32, i32
  }
  func.func @transform_3(%arg0: i32) -> (i32, i32) {
    %c0_i32 = arith.constant 0 : i32
    %c0_i32_0 = arith.constant 0 : i32
    return %arg0, %c0_i32 : i32, i32
  }
}

</mosaic_0001>

<bundles_post_ra>
// kernel: depthwise_conv1d.1
= control target key start
LH: loop header
LB: loop body
LE: loop exit
PB: predicated region body
PF: predicated region fallthrough
CT: control target
= control target key end

     0   :  { %v93_v1 = vmov 2   ;;  %v94_v2 = vmov 0   ;;  %s131_s0 = inlined_call_operand.vmem [shape: f32[8,128], index: 0, kind: input, shape index: {}]   ;;  %s132_s1 = inlined_call_operand.vmem [shape: f32[8,3], index: 1, kind: input, shape index: {}]   ;;  %s133_s2 = inlined_call_operand.vmem [shape: f32[8,1], index: 2, kind: input, shape index: {}]   ;;  %s134_s3 = inlined_call_operand.hbm [shape: f32[8,128], index: 3, kind: output, shape index: {}]  }
   0x1   :  { %v16_v0 = vld [vmem:[%s132_s1] sm:$0xff]  ;;  %69 = vset.pattern.permute.xlu1 %v93_v1  ;;  %67 = vset.pattern.permute.xlu0 %v94_v2 }
   0x2   :  { %8 = vsyncpa [#allocation3], 0  ;;  %34 = vperm.xlu1 %69, %v16_v0   ;;  %21 = vperm.xlu0 %67, %v16_v0   ;;  %v15_v3 = vld [vmem:[%s131_s0] sm:$0xff]  ;;  %v95_v4 = vmov 1   ;;  %s96_s16 = smov 2   ;;  %s97_s1 = smov 1  }
   0x3   :  { %v39_v5 = vld [vmem:[%s133_s2] sm:$0xff]  ;;  %s98_s0 = smov [#allocation2]  }
   0x4   :  { %s53_s19 = sshll.u32 %s98_s0, 4  ;;  %s54_s19 = int_to_ptr.vmem [resolvable:$true] %s53_s19 }
   0x5   :  { %s71_s2 = scalar_lea.vmem %s54_s19, 128  ;;  %p76_p1 = scmp.lt.s32.totalorder %s54_s19, %s54_s19 }
   0x6   :  { %68 = vset.pattern.permute.xlu0 %v95_v4  ;;  %17 = vrot.lane.b32.xlu1 %v15_v3, %s96_s16  ;;  %p72_p0 = scmp.ne.s32.totalorder %s54_s19, %s71_s2  ;;  %p77_p2 = scmp.lt.s32.totalorder %s71_s2, %s71_s2 }
   0x7   :  { %28 = vperm.xlu0 %68, %v16_v0  }
   0x8   :  { %p78_p3 = por %p77_p2, %p76_p1 }
   0xa   :  { %25 = vrot.lane.b32.xlu1 %v15_v3, %s97_s1  ;;  %p79_p4 = pnand %p78_p3, %p72_p0 }
   0xb   :  { %70 = vset.pattern.permute.xlu0 %v94_v2 }
   0xc   :  { %42 = vperm.xlu0 %70, %v39_v5  }
  0x7d   :  { %v35_v6 = vpop.permute.xlu1 %34  ;;  %v22_v7 = vpop.permute.xlu0 %21 }
  0x7e   :  { %v37_v13 = vmul.f32 %v35_v6, %v15_v3 }
  0x81   :  { %v18_v8 = vpop.permute.xlu1 %17 }
  0x82   :  { %v29_v9 = vpop.permute.xlu0 %28  ;;  %v24_v11 = vmul.f32 %v22_v7, %v18_v8 }
  0x85   :  { %v26_v10 = vpop.permute.xlu1 %25 }
  0x86   :  { %v31_v12 = vmul.f32 %v29_v9, %v26_v10 }
  0x87   :  { %v43_v15 = vpop.permute.xlu0 %42 }
  0x88   :  { %v32_v14 = vadd.f32 %v31_v12, %v24_v11 }
  0x8a   :  { %v38_v16 = vadd.f32 %v37_v13, %v32_v14 }
  0x8c   :  { %v45_v17 = vadd.f32 %v43_v15, %v38_v16 }
  0x8e   :  { %46 = vst [vmem:[#allocation2] sm:$0xff] %v45_v17 }
  0x8f   :  { %82 = shalt.err (!%p79_p4)
}
  0x90   :  { %56 = dma.vmem_to_hbm [thread:$0]  %s54_s19, 128, %s134_s3, [#allocation3]  }
  0x91   :  { %91 = dma.done.wait [#allocation3], 128  }
  0x92   :  { %92 = vsyncadd [#allocation3], 4294967168 }
  0x93   :  { %60 = vsyncpa [#allocation3], 1 }

</bundles_post_ra>
